<compile_context>
chip_gen: v7x
topology: tpu7x:2x2x1
jax: 0.10.0
libtpu: 0.0.40
codegen_flags: <defaults>
</compile_context>

<pallas_src>
import functools
import math

import jax
import jax.numpy as jnp
from jax.experimental import pallas as pl
from jax.experimental.pallas import tpu as pltpu


def _round_up(x, m):
    return ((x + m - 1) // m) * m


def _vmem_capacity_bytes():
    """Per-core VMEM capacity (generation-aware); conservative fallback."""
    try:
        cap = int(pltpu.get_tpu_info().vmem_capacity_bytes)
        if cap > 0:
            return cap
    except Exception:
        pass
    return 64 * 2**20          # v7x per-TensorCore capacity (smallest current)


def _num_tensorcores():
    """TensorCores per chip (2 on v7x, 1 on v5e/v6e); conservative fallback 1."""
    try:
        info = pltpu.get_tpu_info()
        for attr in ("num_tensorcores", "tensorcores_per_chip", "num_cores",
                     "core_count"):
            v = getattr(info, attr, None)
            if v is not None:
                v = int(v)
                if 0 < v <= 16:
                    return v
    except Exception:
        pass
    try:
        if "v7" in jax.devices()[0].device_kind.lower():
            return 2
    except Exception:
        pass
    return 1


# ----------------------------------------------------------------------------
# Pallas kernel: strided terrain sub-sampling
# ----------------------------------------------------------------------------
def _sample_kernel(x_ref, colsel_ref, out_ref):
    """x_ref:      (Bk, Hk, Wp)  every stride-th terrain row, width-padded
       colsel_ref: (Wp, Wsp)     0/1 column-selection matrix (grid-invariant)
       out_ref:    (Bk, Hk, Wsp) terrain[::stride, ::stride], lane-padded
    """
    bk, hk, wp = x_ref.shape
    wsp = colsel_ref.shape[1]
    # Leading-dim collapse is layout-trivial (hk % 8 == 0 or bk == 1 by
    # construction); one big matmul keeps the MXU M dim large.
    flat = x_ref[...].reshape(bk * hk, wp)
    sampled = jnp.dot(flat, colsel_ref[...],
                      preferred_element_type=jnp.float32)   # (Bk*Hk, Wsp)
    out_ref[...] = sampled.reshape(bk, hk, wsp)


def _vmem_footprint(bk, hk, Wp, Wsp):
    """f32 VMEM bytes for one grid step (dense blocks, double-buffered)."""
    hk8 = _round_up(hk, 8)
    in_buf = bk * hk8 * Wp * 4
    out_buf = bk * hk8 * Wsp * 4
    col_buf = _round_up(Wp, 8) * Wsp * 4
    # TODO(synk): mark the grid-invariant col_sel BlockSpec
    # pipeline_mode=pl.Buffered(1) once verified on the target jax build;
    # until then it is conservatively counted double-buffered here.
    return 2 * in_buf + 2 * out_buf + 2 * col_buf


def _choose_blocks(B, Hs, Wp, Wsp, budget_bytes, num_cores):
    bk, hk = B, Hs
    if Hs % 8 != 0:
        bk = 1        # keeps the in-kernel leading-dim reshape layout-trivial

    # Biggest block that fits the budget: large tiles amortize ~0.35us/step
    # grid overhead and keep the MXU M dim (Bk*Hk) comfortably >= 256.
    while _vmem_footprint(bk, hk, Wp, Wsp) > budget_bytes and (bk > 1 or hk > 8):
        if bk > 1:
            bk = pl.cdiv(bk, 2)
        else:
            hk = max(8, _round_up(pl.cdiv(hk, 2), 8))   # keep Hk % 8 == 0

    # Multi-TensorCore chips (v7x): force >= 2 grid steps along a "parallel"
    # axis so both cores' DMA paths pull HBM concurrently. On 1-TC chips keep
    # the single biggest block (extra steps are pure overhead there).
    if num_cores >= 2 and pl.cdiv(B, bk) * pl.cdiv(Hs, hk) < 2:
        if B > 1:
            bk = pl.cdiv(B, 2)
        elif Hs > 8:
            hk = max(8, _round_up(pl.cdiv(Hs, 2), 8))
    return bk, hk


def terrain_sampled(x_bhw, *, stride):
    """Pallas launch; returns terrain[:, ::stride, ::stride] as [B, Hs, Ws] f32."""
    B, H, W = x_bhw.shape
    Hs = pl.cdiv(H, stride)
    Ws = pl.cdiv(W, stride)
    Hp = Hs * stride                    # complete stride-groups along H
    Wp = _round_up(W, 128)              # lane-align the per-row DMA slice

    if Hp != H or Wp != W:              # no-op when already aligned
        x_bhw = jnp.pad(x_bhw, ((0, 0), (0, Hp - H), (0, Wp - W)))
    # Row striding via DMA: after this reshape the wanted row of each stride
    # group occupies lanes [0, Wp) of the last dim, so a dense (Bk, Hk, Wp)
    # block at lane-block 0 fetches exactly terrain[:, ::stride, :].
    x3 = x_bhw.reshape(B, Hs, stride * Wp)

    # Column striding via MXU: grid-invariant 0/1 selection matrix, built once
    # in the wrapper and VMEM-resident across all grid steps (constant
    # index_map). Output lane dim padded to Wsp for unmasked stores.
    Wsp = _round_up(Ws, 128)
    col_sel = ((jnp.arange(Wp, dtype=jnp.int32)[:, None] ==
                jnp.arange(Wsp, dtype=jnp.int32)[None, :] * stride) &
               (jnp.arange(Wsp, dtype=jnp.int32)[None, :] < Ws)
               ).astype(jnp.float32)
    # TODO(synk): for v5e with Ws >= ~128 the f32 selection matmul can become
    # MXU-bound; a block-diagonal / strided-lane selection path would be
    # cheaper there but is kept as the robust matmul for all generations.

    cap = _vmem_capacity_bytes()
    num_cores = _num_tensorcores()
    Bk, Hk = _choose_blocks(B, Hs, Wp, Wsp, int(cap * 0.4), num_cores)
    nb, nh = pl.cdiv(B, Bk), pl.cdiv(Hs, Hk)

    needed = _vmem_footprint(Bk, Hk, Wp, Wsp)
    vmem_limit = int(min(max(2 * needed, 32 * 2**20), int(cap * 0.75)))

    out = pl.pallas_call(
        _sample_kernel,
        out_shape=jax.ShapeDtypeStruct((B, Hs, Wsp), jnp.float32),
        grid_spec=pltpu.PrefetchScalarGridSpec(
            num_scalar_prefetch=0,
            grid=(nb, nh),
            in_specs=[
                pl.BlockSpec((Bk, Hk, Wp), lambda b, h: (b, h, 0)),
                pl.BlockSpec((Wp, Wsp), lambda b, h: (0, 0)),
            ],
            out_specs=pl.BlockSpec((Bk, Hk, Wsp), lambda b, h: (b, h, 0)),
        ),
        compiler_params=pltpu.CompilerParams(
            dimension_semantics=("parallel", "parallel"),
            vmem_limit_bytes=vmem_limit),
    )(x3, col_sel)
    return out[:, :, :Ws]


# ----------------------------------------------------------------------------
# Full forward (kernel + deterministic selection glue)
# ----------------------------------------------------------------------------
def terrain_point_cloud(x, *, target_points=16, min_value=0.05, stride=4,
                        normalize_coords=True, importance_scaling=2.0):
    """x: [B, 1, H, W] float32  ->  point cloud [B, target_points, 3]."""
    assert x.shape[1] == 1, "input must be single-channel"
    x_bhw = x[:, 0, :, :].astype(jnp.float32)
    B, H, W = x_bhw.shape

    vals = terrain_sampled(x_bhw, stride=stride)        # (B, Hs, Ws)
    Hs, Ws = vals.shape[1], vals.shape[2]
    S = Hs * Ws
    v_f = vals.reshape(B, S)

    # All candidate thresholds the halving loop can visit; the last one is
    # guaranteed <= 1e-5 so the fused stop condition always fires.
    n_halvings = max(0, int(math.ceil(
        math.log2(max(min_value, 1e-5) / 1e-5))))
    thr = jnp.float32(min_value) * (
        0.5 ** jnp.arange(n_halvings + 1, dtype=jnp.float32))

    sign = 1.0 if importance_scaling >= 0 else -1.0
    h_den = float(max(H - 1, 1))
    w_den = float(max(W - 1, 1))
    tp = int(target_points)
    kk = min(tp, S)

    def select_one(vb):
        # Fused threshold-halving loop: a single broadcast compare + reduction
        # replaces the per-threshold recount of the reference loop.
        counts = jnp.sum(vb[:, None] > thr[None, :], axis=0)        # (K+1,)
        stop = (counts >= tp) | (thr <= 1e-5)
        k_sel = jnp.argmax(stop)                   # first threshold that stops
        mv = thr[k_sel]
        n_valid = counts[k_sel]
        valid = vb > mv

        # Branch A (n_valid > target): deterministic top-k by value. Valid
        # values are > mv > 0 and v**importance_scaling is monotone there, so
        # value order == importance order (the power is never computed).
        # TODO(synk): torch.multinomial importance sampling without
        # replacement is not reproduced; deterministic top-k is used instead.
        key_a = jnp.where(valid, sign * vb, -jnp.inf)
        _, top_a = jax.lax.top_k(key_a, kk)
        idx_topk = top_a[jnp.arange(tp) % kk]

        # Branch B (0 < n_valid <= target): repeat the valid points cyclically
        # in their original flat order (top_k over negated positions yields
        # the first kk valid indices ascending; no full argsort).
        pos = jnp.arange(S, dtype=jnp.int32)
        key_b = jnp.where(valid, -pos, jnp.int32(-S - 1))
        _, first_valid = jax.lax.top_k(key_b, kk)
        n_rep = jnp.clip(n_valid, 1, kk)
        idx_repeat = first_valid[jnp.arange(tp) % n_rep]

        idx = jnp.where(n_valid <= tp, idx_repeat, idx_topk)

        sv = vb[idx]
        # Coordinates are batch-invariant: reconstructed from the flat (Hs,Ws)
        # indices for only the target_points actually consumed.
        h_pix = (idx // Ws).astype(jnp.float32) * float(stride)
        w_pix = (idx % Ws).astype(jnp.float32) * float(stride)
        if normalize_coords:
            sh = h_pix / h_den * 2.0 - 1.0
            sw = w_pix / w_den * 2.0 - 1.0
        else:
            sh, sw = h_pix, w_pix

        # Branch C (n_valid == 0): zeros.
        # TODO(synk): random fallback coords (torch.randint) not reproduced.
        empty = n_valid == 0
        sw = jnp.where(empty, 0.0, sw)
        sh = jnp.where(empty, 0.0, sh)
        sv = jnp.where(empty, 0.0, sv)
        return jnp.stack([sw, sh, sv], axis=1)           # [target_points, 3]

    # TODO(synk): cross-batch mutation of self.min_value (module attribute
    # mutated inside forward) is not reproduced; thresholds are per-batch.
    return jax.vmap(select_one)(v_f)                     # [B, target_points, 3]


# ----------------------------------------------------------------------------
if __name__ == "__main__":
    B, C, H, W = 2, 1, 32, 32
    target_points = 16
    stride = 4

    key = jax.random.PRNGKey(0)
    # Deterministic terrain with some sub-threshold background.
    x = jax.random.uniform(key, (B, C, H, W), dtype=jnp.float32)
    x = jnp.where(x > 0.3, x, 0.0)

    fwd = jax.jit(functools.partial(
        terrain_point_cloud, target_points=target_points, min_value=0.05,
        stride=stride, normalize_coords=True, importance_scaling=2.0))

    pc = jax.block_until_ready(fwd(x))

    assert pc.shape == (B, target_points, 3), pc.shape
    assert bool(jnp.all(jnp.isfinite(pc)))
    print("KERNEL_OK")
</pallas_src>

<mosaic_0001>
module attributes {stable_mosaic.version = 11 : i64} {
  func.func @_sample_kernel(%arg0: i32, %arg1: i32, %arg2: memref<2x8x128xf32, #tpu.memory_space<vmem>>, %arg3: memref<128x128xf32, #tpu.memory_space<vmem>>, %arg4: memref<2x8x128xf32, #tpu.memory_space<vmem>>) attributes {dimension_semantics = [#tpu.dimension_semantics<parallel>, #tpu.dimension_semantics<parallel>], iteration_bounds = array<i64: 1, 1>, scalar_prefetch = 0 : i64, scratch_operands = 0 : i64, tpu.core_type = #tpu.core_type<tc>, window_params = [{transform_indices = @transform_0, window_bounds = array<i64: 2, 8, 128>}, {pipeline_mode = #tpu.pipeline_mode<synchronous>, transform_indices = @transform_1, window_bounds = array<i64: 128, 128>}, {transform_indices = @transform_2, window_bounds = array<i64: 2, 8, 128>}]} {
    %c0 = arith.constant 0 : index
    %c0_0 = arith.constant 0 : index
    %c0_1 = arith.constant 0 : index
    %0 = vector.load %arg2[%c0, %c0_0, %c0_1] : memref<2x8x128xf32, #tpu.memory_space<vmem>>, vector<2x8x128xf32>
    %1 = vector.shape_cast %0 : vector<2x8x128xf32> to vector<16x128xf32>
    %c0_2 = arith.constant 0 : index
    %c0_3 = arith.constant 0 : index
    %2 = vector.load %arg3[%c0_2, %c0_3] : memref<128x128xf32, #tpu.memory_space<vmem>>, vector<128x128xf32>
    %cst = arith.constant dense<0.000000e+00> : vector<16x128xf32>
    %3 = tpu.matmul %1, %2, %cst {dimension_numbers = #tpu.dot_dimension_numbers<[1], [0], [0], [1], [0, 0, 1, 1], [], []>} : vector<16x128xf32>, vector<128x128xf32>, vector<16x128xf32> -> vector<16x128xf32>
    %4 = vector.shape_cast %3 : vector<16x128xf32> to vector<2x8x128xf32>
    %c0_4 = arith.constant 0 : index
    %c0_5 = arith.constant 0 : index
    %c0_6 = arith.constant 0 : index
    %5 = vector.load %arg4[%c0_4, %c0_5, %c0_6] : memref<2x8x128xf32, #tpu.memory_space<vmem>>, vector<2x8x128xf32>
    tpu.vector_store %arg4[%c0_4, %c0_5, %c0_6], %4 {strides = array<i32>} : memref<2x8x128xf32, #tpu.memory_space<vmem>>, vector<2x8x128xf32>,
    return
  }
  func.func @transform_0(%arg0: i32, %arg1: i32) -> (i32, i32, i32) {
    %c0_i32 = arith.constant 0 : i32
    %c0_i32_0 = arith.constant 0 : i32
    return %arg0, %arg1, %c0_i32 : i32, i32, i32
  }
  func.func @transform_1(%arg0: i32, %arg1: i32) -> (i32, i32) {
    %c0_i32 = arith.constant 0 : i32
    %c0_i32_0 = arith.constant 0 : i32
    %c0_i32_1 = arith.constant 0 : i32
    return %c0_i32, %c0_i32_0 : i32, i32
  }
  func.func @transform_2(%arg0: i32, %arg1: i32) -> (i32, i32, i32) {
    %c0_i32 = arith.constant 0 : i32
    %c0_i32_0 = arith.constant 0 : i32
    return %arg0, %arg1, %c0_i32 : i32, i32, i32
  }
}

</mosaic_0001>

<bundles_post_ra>
// kernel: gt.14
= control target key start
LH: loop header
LB: loop body
LE: loop exit
PB: predicated region body
PF: predicated region fallthrough
CT: control target
= control target key end

     0   :  { %s7_s6 = smov 3  ;;  %s21_s9 = smov 3  ;;  %vm4_vm0 = vcmask 64512   ;;  %vm11_vm1 = vcmask 523712   ;;  %vm18_vm2 = vcmask 458112   ;;  %vm25_vm3 = vcmask 392512   ;;  %s119_s0 = inlined_call_operand.vmem [shape: f32[2,8,8], index: 0, kind: input, shape index: {}]   ;;  %s120_s1 = inlined_call_operand.vmem [shape: f32[2,64], index: 1, kind: output, shape index: {}]  }
   0x1   :  { %v61_v0 = vld [vmem:[%s119_s0 + $0x7] ss:$8 sm:%s7_s6]   ;;  %s75_s10 = smov 56   ;;  %v63_v1 = vld [vmem:[%s119_s0 + $0x5] ss:$8 sm:%s21_s9]   ;;  %s14_s13 = smov 3 }
   0x2   :  { %9 = vrot.lane.b32.xlu0 %v61_v0, %s75_s10  ;;  %s76_s14 = smov 40   ;;  %v62_v2 = vld [vmem:[%s119_s0 + $0x6] ss:$8 sm:%s14_s13]   ;;  %s28_s17 = smov 3  ;;  %vm32_vm4 = vcmask 326912   ;;  %vm39_vm5 = vcmask 261312  }
   0x3   :  { %23 = vrot.lane.b32.xlu1 %v63_v1, %s76_s14  ;;  %v64_v3 = vld [vmem:[%s119_s0 + $0x4] ss:$8 sm:%s28_s17]   ;;  %s35_s20 = smov 3  ;;  %s42_s21 = smov 3  ;;  %vm46_vm6 = vcmask 195712   ;;  %vm53_vm7 = vcmask 130112  }
   0x4   :  { %s77_s22 = smov 48   ;;  %s78_s23 = smov 32   ;;  %v65_v4 = vld [vmem:[%s119_s0 + $0x3] ss:$8 sm:%s35_s20]   ;;  %v66_v5 = vld [vmem:[%s119_s0 + $0x2] ss:$8 sm:%s42_s21]  }
   0x5   :  { %s2_s26 = smov 3  ;;  %s49_s29 = smov 3 }
   0x6   :  { %16 = vrot.lane.b32.xlu0 %v62_v2, %s77_s22  ;;  %v3_v6 = vld [vmem:[%s119_s0] ss:$8 sm:%s2_s26]   ;;  %s79_s3 = smov 24   ;;  %s80_s4 = smov 16  }
   0x7   :  { %30 = vrot.lane.b32.xlu1 %v64_v3, %s78_s23  ;;  %5 = vst.msk [vmem:[#allocation0] sm:$0x3] %vm4_vm0, %v3_v6   ;;  %v67_v7 = vld [vmem:[%s119_s0 + $0x1] ss:$8 sm:%s49_s29]   ;;  %s81_s0 = smov 8  }
   0xa   :  { %37 = vrot.lane.b32.xlu0 %v65_v4, %s79_s3 }
   0xb   :  { %44 = vrot.lane.b32.xlu1 %v66_v5, %s80_s4 }
   0xe   :  { %51 = vrot.lane.b32.xlu0 %v67_v7, %s81_s0 }
  0x74   :  { %v10_v8 = vpop.permute.xlu0 %9  }
  0x75   :  { %12 = vst.msk [vmem:[#allocation0] sm:$0x3] %vm11_vm1, %v10_v8   ;;  %v24_v9 = vpop.permute.xlu1 %23  }
  0x78   :  { %v17_v10 = vpop.permute.xlu0 %16  }
  0x79   :  { %19 = vst.msk [vmem:[#allocation0] sm:$0x3] %vm18_vm2, %v17_v10   ;;  %v31_v11 = vpop.permute.xlu1 %30  }
  0x7a   :  { %26 = vst.msk [vmem:[#allocation0] sm:$0x3] %vm25_vm3, %v24_v9  }
  0x7b   :  { %33 = vst.msk [vmem:[#allocation0] sm:$0x3] %vm32_vm4, %v31_v11  }
  0x7c   :  { %v38_v12 = vpop.permute.xlu0 %37  }
  0x7d   :  { %40 = vst.msk [vmem:[#allocation0] sm:$0x3] %vm39_vm5, %v38_v12   ;;  %v45_v13 = vpop.permute.xlu1 %44  }
  0x7e   :  { %47 = vst.msk [vmem:[#allocation0] sm:$0x3] %vm46_vm6, %v45_v13  }
  0x80   :  { %v52_v14 = vpop.permute.xlu0 %51  }
  0x81   :  { %54 = vst.msk [vmem:[#allocation0] sm:$0x3] %vm53_vm7, %v52_v14  }
  0x88   :  { %v58_v15 = vld [vmem:[#allocation0] sm:$0x3] }
  0x89   :  { %60 = vst [vmem:[%s120_s1] sm:$0x3] %v58_v15 }

// kernel: terrain_point_cloud.1
= control target key start
LH: loop header
LB: loop body
LE: loop exit
PB: predicated region body
PF: predicated region fallthrough
CT: control target
= control target key end

     0   :  { %s312_s0 = inlined_call_operand.vmem [shape: f32[2,8,512], index: 0, kind: input, shape index: {}]   ;;  %s313_s1 = inlined_call_operand.vmem [shape: f32[128,128], index: 1, kind: input, shape index: {}]   ;;  %s314_s2 = inlined_call_operand.vmem [shape: f32[2,8,128], index: 2, kind: output, shape index: {}]  }
   0x1   :  { %v51_v0 = vld [vmem:[%s313_s1] sm:$0xff]  ;;  %v52_v1 = vld [vmem:[%s313_s1 + $0x8] sm:$0xff]  ;;  %v53_v2 = vld [vmem:[%s313_s1 + $0x10] sm:$0xff] }
   0x2   :  { %v205_v3 = vpack.c.bf16 %v52_v1, %v51_v0  ;;  %v54_v4 = vld [vmem:[%s313_s1 + $0x18] sm:$0xff]  ;;  %v55_v6 = vld [vmem:[%s313_s1 + $0x20] sm:$0xff]  ;;  %v56_v7 = vld [vmem:[%s313_s1 + $0x28] sm:$0xff] }
   0x3   :  { %v209_v5 = vpack.c.bf16 %v54_v4, %v53_v2  ;;  %v213_v8 = vpack.c.bf16 %v56_v7, %v55_v6  ;;  %v38_v9 = vld [vmem:[%s312_s0] sm:$0xff]  ;;  %v57_v10 = vld [vmem:[%s313_s1 + $0x30] sm:$0xff]  ;;  %v58_v11 = vld [vmem:[%s313_s1 + $0x38] sm:$0xff] }
   0x4   :  { %206 = vmatprep.subr.bf16.mxu0 %v205_v3  ;;  %202 = vmatprep.mubr.f32.mxu0 %v38_v9  ;;  %v217_v12 = vpack.c.bf16 %v58_v11, %v57_v10  ;;  %v59_v13 = vld [vmem:[%s313_s1 + $0x40] sm:$0xff]  ;;  %v60_v14 = vld [vmem:[%s313_s1 + $0x48] sm:$0xff]  ;;  %v61_v16 = vld [vmem:[%s313_s1 + $0x50] sm:$0xff] }
   0x5   :  { %208 = vmatpush3.bf16.msra.mxu0 %v205_v3  ;;  %v221_v15 = vpack.c.bf16 %v60_v14, %v59_v13  ;;  %v62_v17 = vld [vmem:[%s313_s1 + $0x58] sm:$0xff]  ;;  %v63_v19 = vld [vmem:[%s313_s1 + $0x60] sm:$0xff]  ;;  %v64_v20 = vld [vmem:[%s313_s1 + $0x68] sm:$0xff] }
   0x6   :  { %210 = vmatprep.subr.bf16.mxu0 %v209_v5  ;;  %v225_v18 = vpack.c.bf16 %v62_v17, %v61_v16  ;;  %v229_v21 = vpack.c.bf16 %v64_v20, %v63_v19  ;;  %v65_v22 = vld [vmem:[%s313_s1 + $0x70] sm:$0xff]  ;;  %v66_v23 = vld [vmem:[%s313_s1 + $0x78] sm:$0xff]  ;;  %v40_v25 = vld [vmem:[%s312_s0 + $0x20] sm:$0xff] }
   0x7   :  { %v233_v24 = vpack.c.bf16 %v66_v23, %v65_v22 }
   0x9   :  { %212 = vmatpush3.bf16.msra.mxu0 %v209_v5 }
   0xa   :  { %214 = vmatprep.subr.bf16.mxu0 %v213_v8 }
   0xd   :  { %216 = vmatpush3.bf16.msra.mxu0 %v213_v8 }
   0xe   :  { %218 = vmatprep.subr.bf16.mxu0 %v217_v12 }
  0x11   :  { %220 = vmatpush3.bf16.msra.mxu0 %v217_v12 }
  0x12   :  { %222 = vmatprep.subr.bf16.mxu0 %v221_v15 }
  0x15   :  { %224 = vmatpush3.bf16.msra.mxu0 %v221_v15 }
  0x16   :  { %226 = vmatprep.subr.bf16.mxu0 %v225_v18 }
  0x19   :  { %228 = vmatpush3.bf16.msra.mxu0 %v225_v18 }
  0x1a   :  { %230 = vmatprep.subr.bf16.mxu0 %v229_v21 }
  0x1d   :  { %232 = vmatpush3.bf16.msra.mxu0 %v229_v21 }
  0x1e   :  { %234 = vmatprep.subr.bf16.mxu0 %v233_v24 }
  0x21   :  { %236 = vmatpush3.bf16.msra.mxu0 %v233_v24 }
  0x24   :  { %203 = vmatmul.mubr.f32.vlgmr.msra.gmra.mrb[0].mxu0 %v40_v25 }
  0xf7   :  { %v204_v26 = vpop.f32.mrb[0].mxu0 }
  0xf8   :  { %143 = vst [vmem:[%s314_s2 + $0x8] sm:$0xff] %v204_v26  ;;  %v133_v27 = vpop.f32.mrb[1].mxu0 }
  0xf9   :  { %142 = vst [vmem:[%s314_s2] sm:$0xff] %v133_v27 }

</bundles_post_ra>
